<compile_context>
chip_gen: v7x
topology: tpu7x:2x2x1
jax: 0.10.0
libtpu: 0.0.40
codegen_flags: <defaults>
</compile_context>

<pallas_src>
import functools

import jax
import jax.numpy as jnp
from jax.experimental import pallas as pl
from jax.experimental.pallas import tpu as pltpu


# ---------------------------------------------------------------------------
# Tiled linear: y = x @ W^T (+ b), W in torch nn.Linear layout [Nout, K]
# ---------------------------------------------------------------------------
def linear_nobias_kernel(x_ref, w_ref, o_ref, acc_ref):
    @pl.when(pl.program_id(2) == 0)
    def _():
        acc_ref[...] = jnp.zeros_like(acc_ref)

    # Contract last dims of x [tm, tk] and w [tn, tk] -> [tm, tn] (no w.T).
    acc_ref[...] += jax.lax.dot_general(
        x_ref[...], w_ref[...],
        dimension_numbers=(((1,), (1,)), ((), ())),
        preferred_element_type=jnp.float32)

    @pl.when(pl.program_id(2) == pl.num_programs(2) - 1)
    def _():
        o_ref[...] = acc_ref[...].astype(o_ref.dtype)


def linear_bias_kernel(x_ref, w_ref, b_ref, o_ref, acc_ref):
    @pl.when(pl.program_id(2) == 0)
    def _():
        acc_ref[...] = jnp.zeros_like(acc_ref)

    acc_ref[...] += jax.lax.dot_general(
        x_ref[...], w_ref[...],
        dimension_numbers=(((1,), (1,)), ((), ())),
        preferred_element_type=jnp.float32)

    @pl.when(pl.program_id(2) == pl.num_programs(2) - 1)
    def _():
        o_ref[...] = (acc_ref[...] + b_ref[...]).astype(o_ref.dtype)


def _pick_tile(size, target):
    """Use `target` when it evenly divides `size`, else fall back to full size."""
    # TODO(synk): add masked remainder blocks so irregular sizes (e.g. M=B*197)
    # still tile instead of falling back to an untiled axis.
    return target if (size % target == 0) else size


def linear(x2d, w, b=None, *, tm=256, tn=256, tk=512):
    """x2d: [M, K]; w: [Nout, K] (torch layout); b: [Nout] or None."""
    M, K = x2d.shape
    Nout, K2 = w.shape
    assert K == K2

    tm = _pick_tile(M, tm)
    tn = _pick_tile(Nout, tn)
    tk = _pick_tile(K, tk)
    grid = (M // tm, Nout // tn, K // tk)

    x_spec = pl.BlockSpec((tm, tk), lambda i, j, k: (i, k))
    w_spec = pl.BlockSpec((tn, tk), lambda i, j, k: (j, k))
    o_spec = pl.BlockSpec((tm, tn), lambda i, j, k: (i, j))
    scratch = [pltpu.VMEM((tm, tn), jnp.float32)]
    cparams = pltpu.CompilerParams(
        dimension_semantics=("parallel", "parallel", "arbitrary"))

    if b is None:
        return pl.pallas_call(
            linear_nobias_kernel,
            out_shape=jax.ShapeDtypeStruct((M, Nout), x2d.dtype),
            grid=grid,
            in_specs=[x_spec, w_spec],
            out_specs=o_spec,
            scratch_shapes=scratch,
            compiler_params=cparams,
        )(x2d, w)

    b_spec = pl.BlockSpec((1, tn), lambda i, j, k: (0, j))
    return pl.pallas_call(
        linear_bias_kernel,
        out_shape=jax.ShapeDtypeStruct((M, Nout), x2d.dtype),
        grid=grid,
        in_specs=[x_spec, w_spec, b_spec],
        out_specs=o_spec,
        scratch_shapes=scratch,
        compiler_params=cparams,
    )(x2d, w, b.reshape(1, Nout))


# ---------------------------------------------------------------------------
# Fused multi-head attention core: all heads per grid step, lane-dense output
# ---------------------------------------------------------------------------
def attn_kernel(qkv_ref, o_ref, *, heads, dim_head, scale):
    # qkv_ref block: [1, N, 3*H*D] for one batch element (q | k | v packed).
    inner = heads * dim_head
    qkv = qkv_ref[0]                                        # [N, 3*inner]

    outs = []
    for h in range(heads):                                  # static unroll over heads
        q = qkv[:, h * dim_head:(h + 1) * dim_head] * scale             # pre-scaled q
        k = qkv[:, inner + h * dim_head: inner + (h + 1) * dim_head]
        v = qkv[:, 2 * inner + h * dim_head: 2 * inner + (h + 1) * dim_head]

        # q @ k^T without an explicit transpose: contract the last dims.
        dots = jax.lax.dot_general(
            q, k, dimension_numbers=(((1,), (1,)), ((), ())),
            preferred_element_type=jnp.float32)             # [N, N]
        dots = dots - jnp.max(dots, axis=-1, keepdims=True)
        p = jnp.exp(dots)
        p = p * pl.reciprocal(jnp.sum(p, axis=-1, keepdims=True), approx=True)
        outs.append(jnp.dot(p.astype(v.dtype), v,
                            preferred_element_type=jnp.float32))        # [N, D]

    # Merge heads 'b h n d -> b n (h d)' in-kernel; single lane-dense store.
    o_ref[0] = jnp.concatenate(outs, axis=-1).astype(o_ref.dtype)

    # TODO(synk): for long sequences (N >~ 1-2k), switch to a flash-style
    # online-softmax with a KV grid axis instead of the full [N, N] scores.


def attention_core(qkv, heads, dim_head, scale):
    """qkv: [B, N, 3*H*D]  ->  out: [B, N, H*D] (heads merged, lane-dense)."""
    B, N, three_inner = qkv.shape
    inner = heads * dim_head
    return pl.pallas_call(
        functools.partial(attn_kernel, heads=heads, dim_head=dim_head, scale=scale),
        out_shape=jax.ShapeDtypeStruct((B, N, inner), qkv.dtype),
        grid=(B,),
        in_specs=[pl.BlockSpec((1, N, three_inner), lambda b: (b, 0, 0))],
        out_specs=pl.BlockSpec((1, N, inner), lambda b: (b, 0, 0)),
        compiler_params=pltpu.CompilerParams(dimension_semantics=("parallel",)),
    )(qkv)


# ---------------------------------------------------------------------------
# Full forward pass
# ---------------------------------------------------------------------------
def attention_forward(x, w_qkv, w_out, b_out, heads, dim_head):
    B, N, dim = x.shape
    inner = heads * dim_head
    scale = dim_head ** -0.5

    # to_qkv: Linear(dim -> 3*inner, bias=False); torch layout weight, no zero-bias.
    x2d = x.reshape(B * N, dim)
    qkv = linear(x2d, w_qkv).reshape(B, N, 3 * inner)       # [B, N, 3*inner]

    # fused multi-head attention; output already in 'b n (h d)' layout
    o = attention_core(qkv, heads, dim_head, scale)         # [B, N, inner]

    # to_out: Linear(inner -> dim) (+ bias); dropout p=0.0 omitted
    y = linear(o.reshape(B * N, inner), w_out, b_out)       # [B*N, dim]
    return y.reshape(B, N, dim)


# ---------------------------------------------------------------------------
if __name__ == "__main__":
    B, N, dim = 2, 8, 32
    heads, dim_head = 2, 16
    inner = heads * dim_head

    key = jax.random.PRNGKey(0)
    kx, kq, ko, kb = jax.random.split(key, 4)
    x = jax.random.normal(kx, (B, N, dim), jnp.float32)
    # torch nn.Linear weight layout: [out_features, in_features]
    w_qkv = jax.random.normal(kq, (3 * inner, dim), jnp.float32) * 0.1
    w_out = jax.random.normal(ko, (dim, inner), jnp.float32) * 0.1
    b_out = jax.random.normal(kb, (dim,), jnp.float32) * 0.1

    out = attention_forward(x, w_qkv, w_out, b_out, heads, dim_head)
    out = jax.block_until_ready(out)

    # pure-JAX reference (mirrors the PyTorch forward exactly; dropout p=0.0)
    scale = dim_head ** -0.5
    qkv_ref = x @ w_qkv.T
    q_r, k_r, v_r = jnp.split(qkv_ref, 3, axis=-1)

    def to_bhnd(t):
        return jnp.transpose(t.reshape(B, N, heads, dim_head), (0, 2, 1, 3))

    q_r, k_r, v_r = to_bhnd(q_r), to_bhnd(k_r), to_bhnd(v_r)
    dots = jnp.einsum("bhnd,bhmd->bhnm", q_r, k_r) * scale
    attn = jax.nn.softmax(dots, axis=-1)
    o_ref = jnp.einsum("bhnm,bhmd->bhnd", attn, v_r)
    o_ref = jnp.transpose(o_ref, (0, 2, 1, 3)).reshape(B, N, inner)
    ref = o_ref @ w_out.T + b_out

    # approx=True reciprocal slightly loosens tolerance vs exact softmax
    assert jnp.allclose(out, ref, atol=2e-3, rtol=2e-3), "mismatch vs reference"
    print("KERNEL_OK")
</pallas_src>

<mosaic_0001>
module attributes {stable_mosaic.version = 11 : i64} {
  func.func @linear_nobias_kernel(%arg0: i32, %arg1: i32, %arg2: i32, %arg3: memref<16x32xf32, #tpu.memory_space<vmem>>, %arg4: memref<96x32xf32, #tpu.memory_space<vmem>>, %arg5: memref<16x96xf32, #tpu.memory_space<vmem>>, %arg6: memref<16x96xf32, #tpu.memory_space<vmem>>) attributes {dimension_semantics = [#tpu.dimension_semantics<parallel>, #tpu.dimension_semantics<parallel>, #tpu.dimension_semantics<arbitrary>], iteration_bounds = array<i64: 1, 1, 1>, scalar_prefetch = 0 : i64, scratch_operands = 1 : i64, tpu.core_type = #tpu.core_type<tc>, window_params = [{transform_indices = @transform_0, window_bounds = array<i64: 16, 32>}, {transform_indices = @transform_1, window_bounds = array<i64: 96, 32>}, {transform_indices = @transform_2, window_bounds = array<i64: 16, 96>}]} {
    %c0_i32 = arith.constant 0 : i32
    %0 = arith.cmpi eq, %arg2, %c0_i32 : i32
    %1 = arith.extui %0 : i1 to i32
    %c0_i32_0 = arith.constant 0 : i32
    %2 = arith.cmpi ne, %1, %c0_i32_0 : i32
    scf.if %2 {
      %cst_10 = arith.constant 0.000000e+00 : f32
      %12 = vector.broadcast %cst_10 : f32 to vector<16x96xf32>
      %c0_11 = arith.constant 0 : index
      %c0_12 = arith.constant 0 : index
      %13 = vector.load %arg6[%c0_11, %c0_12] : memref<16x96xf32, #tpu.memory_space<vmem>>, vector<16x96xf32>
      tpu.vector_store %arg6[%c0_11, %c0_12], %12 {strides = array<i32>} : memref<16x96xf32, #tpu.memory_space<vmem>>, vector<16x96xf32>,
    } else {
    }
    %c0 = arith.constant 0 : index
    %c0_1 = arith.constant 0 : index
    %3 = vector.load %arg6[%c0, %c0_1] : memref<16x96xf32, #tpu.memory_space<vmem>>, vector<16x96xf32>
    %c0_2 = arith.constant 0 : index
    %c0_3 = arith.constant 0 : index
    %4 = vector.load %arg3[%c0_2, %c0_3] : memref<16x32xf32, #tpu.memory_space<vmem>>, vector<16x32xf32>
    %c0_4 = arith.constant 0 : index
    %c0_5 = arith.constant 0 : index
    %5 = vector.load %arg4[%c0_4, %c0_5] : memref<96x32xf32, #tpu.memory_space<vmem>>, vector<96x32xf32>
    %cst = arith.constant dense<0.000000e+00> : vector<16x96xf32>
    %6 = tpu.matmul %4, %5, %cst {dimension_numbers = #tpu.dot_dimension_numbers<[1], [1], [0], [0], [0, 0, 1, 0], [], []>} : vector<16x32xf32>, vector<96x32xf32>, vector<16x96xf32> -> vector<16x96xf32>
    %7 = arith.addf %3, %6 : vector<16x96xf32>
    %c0_6 = arith.constant 0 : index
    %c0_7 = arith.constant 0 : index
    %8 = vector.load %arg6[%c0_6, %c0_7] : memref<16x96xf32, #tpu.memory_space<vmem>>, vector<16x96xf32>
    tpu.vector_store %arg6[%c0_6, %c0_7], %7 {strides = array<i32>} : memref<16x96xf32, #tpu.memory_space<vmem>>, vector<16x96xf32>,
    %c0_i32_8 = arith.constant 0 : i32
    %9 = arith.cmpi eq, %arg2, %c0_i32_8 : i32
    %10 = arith.extui %9 : i1 to i32
    %c0_i32_9 = arith.constant 0 : i32
    %11 = arith.cmpi ne, %10, %c0_i32_9 : i32
    scf.if %11 {
      %c0_10 = arith.constant 0 : index
      %c0_11 = arith.constant 0 : index
      %12 = vector.load %arg6[%c0_10, %c0_11] : memref<16x96xf32, #tpu.memory_space<vmem>>, vector<16x96xf32>
      %c0_12 = arith.constant 0 : index
      %c0_13 = arith.constant 0 : index
      %13 = vector.load %arg5[%c0_12, %c0_13] : memref<16x96xf32, #tpu.memory_space<vmem>>, vector<16x96xf32>
      tpu.vector_store %arg5[%c0_12, %c0_13], %12 {strides = array<i32>} : memref<16x96xf32, #tpu.memory_space<vmem>>, vector<16x96xf32>,
    } else {
    }
    return
  }
  func.func @transform_0(%arg0: i32, %arg1: i32, %arg2: i32) -> (i32, i32) {
    %c0_i32 = arith.constant 0 : i32
    return %arg0, %arg2 : i32, i32
  }
  func.func @transform_1(%arg0: i32, %arg1: i32, %arg2: i32) -> (i32, i32) {
    %c0_i32 = arith.constant 0 : i32
    return %arg1, %arg2 : i32, i32
  }
  func.func @transform_2(%arg0: i32, %arg1: i32, %arg2: i32) -> (i32, i32) {
    %c0_i32 = arith.constant 0 : i32
    return %arg0, %arg1 : i32, i32
  }
}

</mosaic_0001>

<bundles_post_ra>
// kernel: tpu_custom_call.1
= control target key start
LH: loop header
LB: loop body
LE: loop exit
PB: predicated region body
PF: predicated region fallthrough
CT: control target
= control target key end

     0   :  { %vm35_vm0 = vcmask 261120   ;;  %vm16_vm1 = vcmask 785408   ;;  %v300_v6 = vmov 0.0   ;;  %s411_s0 = inlined_call_operand.vmem [shape: f32[16,32], index: 0, kind: input, shape index: {}]   ;;  %s412_s1 = inlined_call_operand.vmem [shape: f32[96,32], index: 1, kind: input, shape index: {}]   ;;  %s413_s2 = inlined_call_operand.hbm [shape: f32[16,96], index: 2, kind: output, shape index: {}]  }
   0x1   :  { %v23_v0 = vld [vmem:[%s412_s1] sm:$0xff]  ;;  %v24_v1 = vld [vmem:[%s412_s1 + $0x8] sm:$0xff]  ;;  %v25_v2 = vld [vmem:[%s412_s1 + $0x10] sm:$0xff]  ;;  %18 = vst.msk [vmem:[#allocation2 + $0x8] sm:$0xff] %vm16_vm1, %v300_v6 }
   0x2   :  { %v236_v3 = vpack.c.bf16 %v24_v1, %v23_v0  ;;  %vm330_vm2 = vmpackc.low %vm35_vm0, %vm35_vm0  ;;  %v26_v5 = vld [vmem:[%s412_s1 + $0x18] sm:$0xff]  ;;  %17 = vst.msk [vmem:[#allocation2] sm:$0xff] %vm16_vm1, %v300_v6  ;;  %v21_v8 = vld [vmem:[%s411_s0] sm:$0xff] }
   0x3   :  { %v242_v7 = vpack.c.bf16 %v26_v5, %v25_v2  ;;  %233 = vmatprep.mubr.msk.f32.mxu0 %vm35_vm0, %v21_v8 }
   0x4   :  { %238 = vmatprep.subr.msk.bf16.mxu0 %vm330_vm2, %v236_v3 }
   0x5   :  { %241 = vmatpush3.bf16.xpose.msk.msra.mxu0 %vm330_vm2, %v236_v3 }
   0x6   :  { %244 = vmatprep.subr.msk.bf16.mxu0 %vm330_vm2, %v242_v7 }
   0x7   :  { %7 = vsyncpa [#allocation4], 0  ;;  %v27_v9 = vld [vmem:[%s412_s1 + $0x20] sm:$0xff]  ;;  %v28_v10 = vld [vmem:[%s412_s1 + $0x28] sm:$0xff] }
   0x8   :  { %v248_v11 = vpack.c.bf16 %v28_v10, %v27_v9  ;;  %v29_v12 = vld [vmem:[%s412_s1 + $0x30] sm:$0xff]  ;;  %v30_v13 = vld [vmem:[%s412_s1 + $0x38] sm:$0xff]  ;;  %v31_v15 = vld [vmem:[%s412_s1 + $0x40] sm:$0xff] }
   0x9   :  { %v254_v14 = vpack.c.bf16 %v30_v13, %v29_v12  ;;  %v32_v16 = vld [vmem:[%s412_s1 + $0x48] sm:$0xff]  ;;  %v33_v18 = vld [vmem:[%s412_s1 + $0x50] sm:$0xff]  ;;  %v34_v19 = vld [vmem:[%s412_s1 + $0x58] sm:$0xff]  ;;  %s301_s1 = smov [#allocation3]  }
   0xa   :  { %v260_v17 = vpack.c.bf16 %v32_v16, %v31_v15  ;;  %v266_v20 = vpack.c.bf16 %v34_v19, %v33_v18  ;;  %v22_v21 = vld [vmem:[%s411_s0 + $0x8] sm:$0xff]  ;;  %v19_v23 = vld [vmem:[#allocation2] sm:$0xff]  ;;  %s170_s9 = sshll.u32 %s301_s1, 4  ;;  %s171_s9 = int_to_ptr.vmem [resolvable:$true] %s170_s9 }
   0xb   :  { %v20_v22 = vld [vmem:[#allocation2 + $0x8] sm:$0xff]  ;;  %s276_s0 = scalar_lea.vmem %s171_s9, 256  ;;  %p281_p1 = scmp.lt.s32.totalorder %s171_s9, %s171_s9 }
   0xc   :  { %p277_p0 = scmp.ne.s32.totalorder %s171_s9, %s276_s0  ;;  %p282_p2 = scmp.lt.s32.totalorder %s276_s0, %s276_s0 }
   0xd   :  { %247 = vmatpush3.bf16.xpose.msk.msra.mxu0 %vm330_vm2, %v242_v7 }
   0xe   :  { %250 = vmatprep.subr.msk.bf16.mxu0 %vm330_vm2, %v248_v11  ;;  %p283_p3 = por %p282_p2, %p281_p1 }
  0x10   :  { %p284_p4 = pnand %p283_p3, %p277_p0 }
  0x15   :  { %253 = vmatpush3.bf16.xpose.msk.msra.mxu0 %vm330_vm2, %v248_v11 }
  0x16   :  { %256 = vmatprep.subr.msk.bf16.mxu0 %vm330_vm2, %v254_v14 }
  0x1d   :  { %259 = vmatpush3.bf16.xpose.msk.msra.mxu0 %vm330_vm2, %v254_v14 }
  0x1e   :  { %262 = vmatprep.subr.msk.bf16.mxu0 %vm330_vm2, %v260_v17 }
  0x25   :  { %265 = vmatpush3.bf16.xpose.msk.msra.mxu0 %vm330_vm2, %v260_v17 }
  0x26   :  { %268 = vmatprep.subr.msk.bf16.mxu0 %vm330_vm2, %v266_v20 }
  0x2d   :  { %271 = vmatpush3.bf16.xpose.msk.msra.mxu0 %vm330_vm2, %v266_v20 }
  0x34   :  { %234 = vmatmul.mubr.msk.f32.vlgmr.msra.gmra.mrb[0].mxu0 %vm35_vm0, %v22_v21 }
 0x107   :  { %v235_v24 = vpop.f32.mrb[0].mxu0 }
 0x108   :  { %v154_v25 = vadd.f32 %v235_v24, %v20_v22  ;;  %v144_v26 = vpop.f32.mrb[1].mxu0 }
 0x109   :  { %v153_v27 = vadd.f32 %v144_v26, %v19_v23 }
 0x10a   :  { %157 = vst.msk [vmem:[#allocation2 + $0x8] sm:$0xff] %vm16_vm1, %v154_v25 }
 0x10b   :  { %156 = vst.msk [vmem:[#allocation2] sm:$0xff] %vm16_vm1, %v153_v27 }
 0x111   :  { %v162_v28 = vld [vmem:[#allocation2 + $0x8] sm:$0xff] }
 0x112   :  { %v161_v29 = vld [vmem:[#allocation2] sm:$0xff]  ;;  %164 = vst.msk [vmem:[#allocation3 + $0x8] sm:$0xff] %vm16_vm1, %v162_v28 }
 0x113   :  { %163 = vst.msk [vmem:[#allocation3] sm:$0xff] %vm16_vm1, %v161_v29 }
 0x114   :  { %287 = shalt.err (!%p284_p4)
}
 0x115   :  { %s288_s12 = scalar_lea.hbm %s413_s2, 256 }
 0x116   :  { %p289_p5 = scmp.ne.s32.totalorder %s413_s2, %s288_s12  ;;  %p292_p6 = scmp.lt.u32.totalorder %s288_s12, %s413_s2 }
 0x118   :  { %p294_p7 = pnand %p292_p6, %p289_p5 }
 0x11a   :  { %297 = shalt.err (!%p294_p7)
}
 0x11b   :  { %s302_s17 = smov 128   ;;  %s303_s18 = smov 8  }
 0x11c   :  { %176 = dma.vmem_to_hbm [thread:$0]  %s171_s9, 256, %s413_s2, [#allocation4], %s302_s17, %s302_s17, %s303_s18  }
 0x11d   :  { %298 = dma.done.wait [#allocation4], 256  }
 0x11e   :  { %299 = vsyncadd [#allocation4], 4294967040 }
 0x11f   :  { %180 = vsyncpa [#allocation4], 1 }

</bundles_post_ra>
